<compile_context>
chip_gen: v5e
topology: v5e:2x2
jax: 0.10.0
libtpu: 0.0.40
codegen_flags: <defaults>
</compile_context>

<pallas_src>
import math

import jax
import jax.numpy as jnp
from jax.experimental import pallas as pl
from jax.experimental.pallas import tpu as pltpu

HIDDEN = 100        # fixed by the ContinualModel docstring
NUM_CLASSES = 10
LANE = 128
SUBLANE = 8


def _round_up(x, m):
    return ((x + m - 1) // m) * m


def _mlp_kernel(x_ref, w1_ref, b1_ref, w2_ref, b2_ref, w3_ref, b3_ref, o_ref):
    # x arrives in its native dtype; cast to bf16 for the MXU inside the
    # kernel (VPU work, fully hidden under the x DMA stream).
    x = x_ref[...].astype(jnp.bfloat16)
    # fc1 + ReLU  (bf16 operands -> f32 accumulation on the MXU)
    h1 = jnp.dot(x, w1_ref[...], preferred_element_type=jnp.float32)
    h1 = jnp.maximum(h1 + b1_ref[...], 0.0)          # f32 VPU epilogue
    # fc2 + ReLU
    h2 = jnp.dot(h1.astype(jnp.bfloat16), w2_ref[...],
                 preferred_element_type=jnp.float32)
    h2 = jnp.maximum(h2 + b2_ref[...], 0.0)
    # classifier (lane-padded to 128 columns -> unmasked, lane-dense stores)
    out = jnp.dot(h2.astype(jnp.bfloat16), w3_ref[...],
                  preferred_element_type=jnp.float32) + b3_ref[...]
    o_ref[...] = out


def continual_model_forward(x_nchw, params, *, tb=512):
    """Forward pass of ContinualModel (i.e. of its MLP backbone)."""
    w1, b1, w2, b2, w3, b3 = params
    # Defensive bias reshape: accept (H,) or (1, H) (e.g. PyTorch state_dict).
    b1 = jnp.reshape(b1, (1, -1))
    b2 = jnp.reshape(b2, (1, -1))
    b3 = jnp.reshape(b3, (1, -1))

    B = x_nchw.shape[0]
    D = math.prod(x_nchw.shape[1:])          # static python int, no device op
    x2d = x_nchw.reshape(B, D)               # free reshape; NO pad, NO cast

    # Lane-friendly padded sizes for the tiny hidden/class dims only.
    H_pad = _round_up(HIDDEN, LANE)          # 128
    C_pad = _round_up(NUM_CLASSES, LANE)     # 128

    # ---- batch tile selection -------------------------------------------
    x_bytes = jnp.dtype(x2d.dtype).itemsize
    if B <= tb:
        # Single tile covering the whole (possibly non-multiple-of-8) batch:
        # block dim == full array dim is always legal.
        TB = B
    else:
        TB = _round_up(tb, SUBLANE)

        # Double-buffered x + out tiles plus resident weights must fit the
        # smallest scoped-VMEM default (v5e: 16 MiB).  Shrink TB if needed.
        def _vmem_est(t):
            return (2 * t * D * x_bytes                      # x tiles
                    + 2 * t * C_pad * 4                      # out tiles (f32)
                    + 2 * (D * H_pad + H_pad * H_pad + H_pad * C_pad) * 2)
        budget = 12 * 1024 * 1024
        while TB > 4 * SUBLANE and _vmem_est(TB) > budget:
            TB //= 2
        TB = max(SUBLANE, _round_up(TB, SUBLANE))

    grid = (pl.cdiv(B, TB),)

    # Pad + cast the (tiny, one-time) weights; zero padding is exact here
    # (zero weight columns/rows, ReLU(0)=0).
    w1p = jnp.pad(w1.astype(jnp.bfloat16), ((0, 0), (0, H_pad - HIDDEN)))
    b1p = jnp.pad(b1.astype(jnp.float32), ((0, 0), (0, H_pad - HIDDEN)))
    w2p = jnp.pad(w2.astype(jnp.bfloat16),
                  ((0, H_pad - HIDDEN), (0, H_pad - HIDDEN)))
    b2p = jnp.pad(b2.astype(jnp.float32), ((0, 0), (0, H_pad - HIDDEN)))
    w3p = jnp.pad(w3.astype(jnp.bfloat16),
                  ((0, H_pad - HIDDEN), (0, C_pad - NUM_CLASSES)))
    b3p = jnp.pad(b3.astype(jnp.float32), ((0, 0), (0, C_pad - NUM_CLASSES)))

    out_padded = pl.pallas_call(
        _mlp_kernel,
        out_shape=jax.ShapeDtypeStruct((B, C_pad), jnp.float32),
        grid_spec=pltpu.PrefetchScalarGridSpec(
            num_scalar_prefetch=0,
            grid=grid,
            in_specs=[
                # x: streamed per batch tile, native dtype, full-D last dim.
                pl.BlockSpec((TB, D), lambda i: (i, 0)),
                # weights/biases: constant index_map -> VMEM-resident,
                # never re-DMA'd across grid steps.
                pl.BlockSpec((D, H_pad), lambda i: (0, 0)),
                pl.BlockSpec((1, H_pad), lambda i: (0, 0)),
                pl.BlockSpec((H_pad, H_pad), lambda i: (0, 0)),
                pl.BlockSpec((1, H_pad), lambda i: (0, 0)),
                pl.BlockSpec((H_pad, C_pad), lambda i: (0, 0)),
                pl.BlockSpec((1, C_pad), lambda i: (0, 0)),
            ],
            out_specs=pl.BlockSpec((TB, C_pad), lambda i: (i, 0)),
        ),
        compiler_params=pltpu.CompilerParams(
            # batch tiles are independent -> shard across TensorCores
            dimension_semantics=("parallel",),
        ),
    )(x2d, w1p, b1p, w2p, b2p, w3p, b3p)

    # Slice back to the true class count before any loss/softmax.
    return out_padded[:, :NUM_CLASSES]


def init_params(key, in_features):
    """Deterministic parameter init matching the backbone shapes."""
    k1, k2, k3 = jax.random.split(key, 3)
    scale1 = 1.0 / jnp.sqrt(in_features)
    scale2 = 1.0 / jnp.sqrt(HIDDEN)
    w1 = jax.random.uniform(k1, (in_features, HIDDEN), jnp.float32, -scale1, scale1)
    b1 = jnp.zeros((HIDDEN,), jnp.float32)
    w2 = jax.random.uniform(k2, (HIDDEN, HIDDEN), jnp.float32, -scale2, scale2)
    b2 = jnp.zeros((HIDDEN,), jnp.float32)
    w3 = jax.random.uniform(k3, (HIDDEN, NUM_CLASSES), jnp.float32, -scale2, scale2)
    b3 = jnp.zeros((NUM_CLASSES,), jnp.float32)
    return (w1, b1, w2, b2, w3, b3)


def _reference_forward(x_nchw, params):
    """Reference using the same bf16-operand / f32-accumulate recipe."""
    w1, b1, w2, b2, w3, b3 = params
    B = x_nchw.shape[0]
    x2d = x_nchw.reshape(B, -1).astype(jnp.bfloat16)
    h1 = jnp.dot(x2d, w1.astype(jnp.bfloat16),
                 preferred_element_type=jnp.float32) + b1.reshape(1, -1)
    h1 = jnp.maximum(h1, 0.0)
    h2 = jnp.dot(h1.astype(jnp.bfloat16), w2.astype(jnp.bfloat16),
                 preferred_element_type=jnp.float32) + b2.reshape(1, -1)
    h2 = jnp.maximum(h2, 0.0)
    return jnp.dot(h2.astype(jnp.bfloat16), w3.astype(jnp.bfloat16),
                   preferred_element_type=jnp.float32) + b3.reshape(1, -1)


# TODO(synk): observe()/loss/optimizer and get_params()/get_grads() are
# training-side utilities with no forward-pass Pallas equivalent; only
# forward() is implemented here.

if __name__ == "__main__":
    key = jax.random.PRNGKey(0)
    kx, kp = jax.random.split(key)

    # Small NCHW batch: B=2, C=4, H=W=16  ->  D = 4*16*16 = 1024
    x = jax.random.normal(kx, (2, 4, 16, 16), dtype=jnp.float32)
    params = init_params(kp, in_features=4 * 16 * 16)

    out = continual_model_forward(x, params)
    out = jax.block_until_ready(out)

    ref = _reference_forward(x, params)
    assert out.shape == (2, NUM_CLASSES)
    assert jnp.allclose(out, ref, atol=1e-2, rtol=1e-2)

    print("KERNEL_OK")
</pallas_src>

<mosaic_0001>
module attributes {stable_mosaic.version = 11 : i64} {
  func.func @_mlp_kernel(%arg0: i32, %arg1: memref<2x1024xf32, #tpu.memory_space<vmem>>, %arg2: memref<1024x128xbf16, #tpu.memory_space<vmem>>, %arg3: memref<1x128xf32, #tpu.memory_space<vmem>>, %arg4: memref<128x128xbf16, #tpu.memory_space<vmem>>, %arg5: memref<1x128xf32, #tpu.memory_space<vmem>>, %arg6: memref<128x128xbf16, #tpu.memory_space<vmem>>, %arg7: memref<1x128xf32, #tpu.memory_space<vmem>>, %arg8: memref<2x128xf32, #tpu.memory_space<vmem>>) attributes {dimension_semantics = [#tpu.dimension_semantics<parallel>], iteration_bounds = array<i64: 1>, scalar_prefetch = 0 : i64, scratch_operands = 0 : i64, tpu.core_type = #tpu.core_type<tc>, window_params = [{transform_indices = @transform_0, window_bounds = array<i64: 2, 1024>}, {pipeline_mode = #tpu.pipeline_mode<synchronous>, transform_indices = @transform_1, window_bounds = array<i64: 1024, 128>}, {pipeline_mode = #tpu.pipeline_mode<synchronous>, transform_indices = @transform_2, window_bounds = array<i64: 1, 128>}, {pipeline_mode = #tpu.pipeline_mode<synchronous>, transform_indices = @transform_3, window_bounds = array<i64: 128, 128>}, {pipeline_mode = #tpu.pipeline_mode<synchronous>, transform_indices = @transform_4, window_bounds = array<i64: 1, 128>}, {pipeline_mode = #tpu.pipeline_mode<synchronous>, transform_indices = @transform_5, window_bounds = array<i64: 128, 128>}, {pipeline_mode = #tpu.pipeline_mode<synchronous>, transform_indices = @transform_6, window_bounds = array<i64: 1, 128>}, {transform_indices = @transform_7, window_bounds = array<i64: 2, 128>}]} {
    %c0 = arith.constant 0 : index
    %c0_0 = arith.constant 0 : index
    %0 = vector.load %arg1[%c0, %c0_0] : memref<2x1024xf32, #tpu.memory_space<vmem>>, vector<2x1024xf32>
    %1 = arith.truncf %0 : vector<2x1024xf32> to vector<2x1024xbf16>
    %c0_1 = arith.constant 0 : index
    %c0_2 = arith.constant 0 : index
    %2 = vector.load %arg2[%c0_1, %c0_2] : memref<1024x128xbf16, #tpu.memory_space<vmem>>, vector<1024x128xbf16>
    %cst = arith.constant dense<0.000000e+00> : vector<2x128xf32>
    %3 = tpu.matmul %1, %2, %cst {dimension_numbers = #tpu.dot_dimension_numbers<[1], [0], [0], [1], [0, 0, 1, 1], [], []>} : vector<2x1024xbf16>, vector<1024x128xbf16>, vector<2x128xf32> -> vector<2x128xf32>
    %c0_3 = arith.constant 0 : index
    %c0_4 = arith.constant 0 : index
    %4 = vector.load %arg3[%c0_3, %c0_4] : memref<1x128xf32, #tpu.memory_space<vmem>>, vector<1x128xf32>
    %5 = vector.broadcast %4 : vector<1x128xf32> to vector<2x128xf32>
    %6 = arith.addf %3, %5 : vector<2x128xf32>
    %cst_5 = arith.constant 0.000000e+00 : f32
    %7 = vector.broadcast %cst_5 : f32 to vector<2x128xf32>
    %8 = arith.maximumf %6, %7 : vector<2x128xf32>
    %9 = arith.truncf %8 : vector<2x128xf32> to vector<2x128xbf16>
    %c0_6 = arith.constant 0 : index
    %c0_7 = arith.constant 0 : index
    %10 = vector.load %arg4[%c0_6, %c0_7] : memref<128x128xbf16, #tpu.memory_space<vmem>>, vector<128x128xbf16>
    %cst_8 = arith.constant dense<0.000000e+00> : vector<2x128xf32>
    %11 = tpu.matmul %9, %10, %cst_8 {dimension_numbers = #tpu.dot_dimension_numbers<[1], [0], [0], [1], [0, 0, 1, 1], [], []>} : vector<2x128xbf16>, vector<128x128xbf16>, vector<2x128xf32> -> vector<2x128xf32>
    %c0_9 = arith.constant 0 : index
    %c0_10 = arith.constant 0 : index
    %12 = vector.load %arg5[%c0_9, %c0_10] : memref<1x128xf32, #tpu.memory_space<vmem>>, vector<1x128xf32>
    %13 = vector.broadcast %12 : vector<1x128xf32> to vector<2x128xf32>
    %14 = arith.addf %11, %13 : vector<2x128xf32>
    %cst_11 = arith.constant 0.000000e+00 : f32
    %15 = vector.broadcast %cst_11 : f32 to vector<2x128xf32>
    %16 = arith.maximumf %14, %15 : vector<2x128xf32>
    %17 = arith.truncf %16 : vector<2x128xf32> to vector<2x128xbf16>
    %c0_12 = arith.constant 0 : index
    %c0_13 = arith.constant 0 : index
    %18 = vector.load %arg6[%c0_12, %c0_13] : memref<128x128xbf16, #tpu.memory_space<vmem>>, vector<128x128xbf16>
    %cst_14 = arith.constant dense<0.000000e+00> : vector<2x128xf32>
    %19 = tpu.matmul %17, %18, %cst_14 {dimension_numbers = #tpu.dot_dimension_numbers<[1], [0], [0], [1], [0, 0, 1, 1], [], []>} : vector<2x128xbf16>, vector<128x128xbf16>, vector<2x128xf32> -> vector<2x128xf32>
    %c0_15 = arith.constant 0 : index
    %c0_16 = arith.constant 0 : index
    %20 = vector.load %arg7[%c0_15, %c0_16] : memref<1x128xf32, #tpu.memory_space<vmem>>, vector<1x128xf32>
    %21 = vector.broadcast %20 : vector<1x128xf32> to vector<2x128xf32>
    %22 = arith.addf %19, %21 : vector<2x128xf32>
    %c0_17 = arith.constant 0 : index
    %c0_18 = arith.constant 0 : index
    %23 = vector.load %arg8[%c0_17, %c0_18] : memref<2x128xf32, #tpu.memory_space<vmem>>, vector<2x128xf32>
    tpu.vector_store %arg8[%c0_17, %c0_18], %22 {strides = array<i32>} : memref<2x128xf32, #tpu.memory_space<vmem>>, vector<2x128xf32>,
    return
  }
  func.func @transform_0(%arg0: i32) -> (i32, i32) {
    %c0_i32 = arith.constant 0 : i32
    %c0_i32_0 = arith.constant 0 : i32
    return %arg0, %c0_i32 : i32, i32
  }
  func.func @transform_1(%arg0: i32) -> (i32, i32) {
    %c0_i32 = arith.constant 0 : i32
    %c0_i32_0 = arith.constant 0 : i32
    %c0_i32_1 = arith.constant 0 : i32
    return %c0_i32, %c0_i32_0 : i32, i32
  }
  func.func @transform_2(%arg0: i32) -> (i32, i32) {
    %c0_i32 = arith.constant 0 : i32
    %c0_i32_0 = arith.constant 0 : i32
    %c0_i32_1 = arith.constant 0 : i32
    return %c0_i32, %c0_i32_0 : i32, i32
  }
  func.func @transform_3(%arg0: i32) -> (i32, i32) {
    %c0_i32 = arith.constant 0 : i32
    %c0_i32_0 = arith.constant 0 : i32
    %c0_i32_1 = arith.constant 0 : i32
    return %c0_i32, %c0_i32_0 : i32, i32
  }
  func.func @transform_4(%arg0: i32) -> (i32, i32) {
    %c0_i32 = arith.constant 0 : i32
    %c0_i32_0 = arith.constant 0 : i32
    %c0_i32_1 = arith.constant 0 : i32
    return %c0_i32, %c0_i32_0 : i32, i32
  }
  func.func @transform_5(%arg0: i32) -> (i32, i32) {
    %c0_i32 = arith.constant 0 : i32
    %c0_i32_0 = arith.constant 0 : i32
    %c0_i32_1 = arith.constant 0 : i32
    return %c0_i32, %c0_i32_0 : i32, i32
  }
  func.func @transform_6(%arg0: i32) -> (i32, i32) {
    %c0_i32 = arith.constant 0 : i32
    %c0_i32_0 = arith.constant 0 : i32
    %c0_i32_1 = arith.constant 0 : i32
    return %c0_i32, %c0_i32_0 : i32, i32
  }
  func.func @transform_7(%arg0: i32) -> (i32, i32) {
    %c0_i32 = arith.constant 0 : i32
    %c0_i32_0 = arith.constant 0 : i32
    return %arg0, %c0_i32 : i32, i32
  }
}

</mosaic_0001>

<bundles_post_ra>
// kernel: tpu_custom_call.1
= control target key start
LH: loop header
LB: loop body
LE: loop exit
PB: predicated region body
PF: predicated region fallthrough
CT: control target
= control target key end

     0   :  { %12 = vsyncpa [#allocation3], 0  ;;  %s1534_s0 = inlined_call_operand.hbm [shape: f32[2,1024], index: 0, kind: input, shape index: {}]   ;;  %s1535_s1 = inlined_call_operand.hbm [shape: bf16[1024,128], index: 1, kind: input, shape index: {}]   ;;  %s1536_s2 = inlined_call_operand.vmem [shape: f32[1,128], index: 2, kind: input, shape index: {}]   ;;  %s1537_s3 = inlined_call_operand.hbm [shape: bf16[128,128], index: 3, kind: input, shape index: {}]   ;;  %s1538_s4 = inlined_call_operand.vmem [shape: f32[1,128], index: 4, kind: input, shape index: {}]   ;;  %s1539_s5 = inlined_call_operand.hbm [shape: bf16[128,128], index: 5, kind: input, shape index: {}]   ;;  %s1540_s6 = inlined_call_operand.vmem [shape: f32[1,128], index: 6, kind: input, shape index: {}]   ;;  %s1541_s7 = inlined_call_operand.hbm [shape: f32[2,128], index: 7, kind: output, shape index: {}]  }
   0x1   :  { %13 = vsyncpa [#allocation6], 0 }
   0x2   :  { %14 = vsyncpa [#allocation9], 0  ;;  %s31_s26 = sshll.u32 %s1535_s1, 4  ;;  %s32_s26 = int_to_ptr.hbm [resolvable:$true] %s31_s26 }
   0x3   :  { %15 = vsyncpa [#allocation4], 0  ;;  %s1463_s27 = smov [#allocation5]   ;;  %s21_s8 = sshll.u32 %s1534_s0, 4  ;;  %s22_s8 = int_to_ptr.hbm [resolvable:$true] %s21_s8 }
   0x4   :  { %s33_s28 = sshll.u32 %s1463_s27, 4  ;;  %s1464_s9 = smov 64   ;;  %s34_s28 = int_to_ptr.vmem [resolvable:$true] %s33_s28 }
   0x5   :  { %s1465_s10 = smov 4   ;;  %s1466_s11 = smov [#allocation2]  }
   0x6   :  { %39 = dma.hbm_to_vmem [thread:$0]  %s32_s26, 8192, %s34_s28, [#allocation6], %s1464_s9, %s1464_s9, %s1465_s10  }
   0x7   :  { %s23_s12 = sshll.u32 %s1466_s11, 4  ;;  %s46_s15 = sshll.u32 %s1537_s3, 4  ;;  %s24_s12 = int_to_ptr.vmem [resolvable:$true] %s23_s12  ;;  %s47_s15 = int_to_ptr.hbm [resolvable:$true] %s46_s15 }
   0x8   :  { %26 = dma.hbm_to_vmem [thread:$0]  %s22_s8, 256, %s24_s12, [#allocation3]  }
   0x9   :  { %s61_s17 = sshll.u32 %s1539_s5, 4  ;;  %s1467_s18 = smov [#allocation7]   ;;  %s62_s17 = int_to_ptr.hbm [resolvable:$true] %s61_s17 }
   0xa   :  { %s48_s19 = sshll.u32 %s1467_s18, 4  ;;  %s1468_s0 = smov [#allocation8]   ;;  %s49_s19 = int_to_ptr.vmem [resolvable:$true] %s48_s19 }
   0xb   :  { %54 = dma.hbm_to_vmem [thread:$0]  %s47_s15, 1024, %s49_s19, [#allocation6], %s1464_s9, %s1464_s9, %s1465_s10  }
   0xc   :  { %s63_s20 = sshll.u32 %s1468_s0, 4  ;;  %s64_s20 = int_to_ptr.vmem [resolvable:$true] %s63_s20 }
   0xd   :  { %69 = dma.hbm_to_vmem [thread:$0]  %s62_s17, 1024, %s64_s20, [#allocation9], %s1464_s9, %s1464_s9, %s1465_s10  }
   0xe   :  { %1455 = dma.done.wait [#allocation3], 256  }
   0xf   :  { %1456 = vsyncadd [#allocation3], 4294967040 }
  0x10   :  { %1457 = dma.done.wait [#allocation6], 9216  }
  0x11   :  { %1458 = vsyncadd [#allocation6], 4294958080 }
  0x12   :  { %1459 = dma.done.wait [#allocation9], 1024  }
  0x13   :  { %1460 = vsyncadd [#allocation9], 4294966272  ;;  %v1252_v0 = vld [vmem:[#allocation5 + $0x38] sm:$0xff]  ;;  %v1251_v4 = vld [vmem:[#allocation5 + $0x30] sm:$0xff]  ;;  %s1469_s24 = smov [#allocation10]   ;;  %s913_s28 = sshll.u32 %s1541_s7, 4  ;;  %s914_s28 = int_to_ptr.hbm [resolvable:$true] %s913_s28 }
  0x14   :  { %v1260_v1 = vld [vmem:[#allocation5 + $0x78] sm:$0xff]  ;;  %635 = vmatpush.bf16.msra.mxu0 %v1252_v0  ;;  %v1259_v5 = vld [vmem:[#allocation5 + $0x70] sm:$0xff]  ;;  %v1250_v8 = vld [vmem:[#allocation5 + $0x28] sm:$0xff]  ;;  %s911_s25 = sshll.u32 %s1469_s24, 4  ;;  %s912_s25 = int_to_ptr.vmem [resolvable:$true] %s911_s25 }
  0x15   :  { %v1268_v2 = vld [vmem:[#allocation5 + $0xb8] sm:$0xff]  ;;  %648 = vmatpush.bf16.msra.mxu1 %v1260_v1  ;;  %v1267_v6 = vld [vmem:[#allocation5 + $0xb0] sm:$0xff]  ;;  %v1258_v9 = vld [vmem:[#allocation5 + $0x68] sm:$0xff] }
  0x16   :  { %v1276_v3 = vld [vmem:[#allocation5 + $0xf8] sm:$0xff]  ;;  %661 = vmatpush.bf16.msra.mxu2 %v1268_v2  ;;  %v1275_v7 = vld [vmem:[#allocation5 + $0xf0] sm:$0xff]  ;;  %v1266_v10 = vld [vmem:[#allocation5 + $0xa8] sm:$0xff] }
  0x17   :  { %674 = vmatpush.bf16.msra.mxu3 %v1276_v3  ;;  %v1274_v11 = vld [vmem:[#allocation5 + $0xe8] sm:$0xff]  ;;  %v1249_v12 = vld [vmem:[#allocation5 + $0x20] sm:$0xff]  ;;  %v88_v16 = vld [vmem:[#allocation2] sm:$0xff] }
  0x18   :  { %636 = vmatpush.bf16.msra.mxu0 %v1251_v4  ;;  %v1257_v13 = vld [vmem:[#allocation5 + $0x60] sm:$0xff]  ;;  %v1248_v17 = vld [vmem:[#allocation5 + $0x18] sm:$0xff]  ;;  %92 = vst [vmem:[#allocation1] ss:$4 sm:$0xff] %v88_v16  ;;  %v1247_v21 = vld [vmem:[#allocation5 + $0x10] sm:$0xff] }
  0x19   :  { %649 = vmatpush.bf16.msra.mxu1 %v1259_v5  ;;  %v1265_v14 = vld [vmem:[#allocation5 + $0xa0] sm:$0xff]  ;;  %v1256_v18 = vld [vmem:[#allocation5 + $0x58] sm:$0xff]  ;;  %v1255_v22 = vld [vmem:[#allocation5 + $0x50] sm:$0xff] }
  0x1a   :  { %662 = vmatpush.bf16.msra.mxu2 %v1267_v6  ;;  %v1273_v15 = vld [vmem:[#allocation5 + $0xe0] sm:$0xff]  ;;  %v1264_v19 = vld [vmem:[#allocation5 + $0x98] sm:$0xff]  ;;  %v1263_v23 = vld [vmem:[#allocation5 + $0x90] sm:$0xff] }
  0x1b   :  { %675 = vmatpush.bf16.msra.mxu3 %v1275_v7  ;;  %v1272_v20 = vld [vmem:[#allocation5 + $0xd8] sm:$0xff]  ;;  %v1271_v24 = vld [vmem:[#allocation5 + $0xd0] sm:$0xff]  ;;  %v1246_v25 = vld [vmem:[#allocation5 + $0x8] sm:$0xff] }
  0x1c   :  { %637 = vmatpush.bf16.msra.mxu0 %v1250_v8  ;;  %v1254_v26 = vld [vmem:[#allocation5 + $0x48] sm:$0xff]  ;;  %v89_v29 = vld [vmem:[#allocation2 + $0x8] sm:$0xff]  ;;  %v1245_v30 = vld [vmem:[#allocation5] sm:$0xff] }
  0x1d   :  { %650 = vmatpush.bf16.msra.mxu1 %v1258_v9  ;;  %v1262_v27 = vld [vmem:[#allocation5 + $0x88] sm:$0xff]  ;;  %v1253_v31 = vld [vmem:[#allocation5 + $0x40] sm:$0xff]  ;;  %94 = vst [vmem:[#allocation1 + $0x20] ss:$4 sm:$0xff] %v89_v29  ;;  %v1284_v34 = vld [vmem:[#allocation5 + $0x138] sm:$0xff] }
  0x1e   :  { %663 = vmatpush.bf16.msra.mxu2 %v1266_v10  ;;  %v1270_v28 = vld [vmem:[#allocation5 + $0xc8] sm:$0xff]  ;;  %v1261_v32 = vld [vmem:[#allocation5 + $0x80] sm:$0xff]  ;;  %v1292_v35 = vld [vmem:[#allocation5 + $0x178] sm:$0xff] }
  0x1f   :  { %676 = vmatpush.bf16.msra.mxu3 %v1274_v11  ;;  %v1269_v33 = vld [vmem:[#allocation5 + $0xc0] sm:$0xff]  ;;  %v97_v36 = vld.sshfl [vmem:[#allocation1 + $0x10] sm:$0xff pattern:$0x73625140]  ;;  %v1283_v46 = vld [vmem:[#allocation5 + $0x130] sm:$0xff] }
  0x20   :  { %638 = vmatpush.bf16.msra.mxu0 %v1249_v12  ;;  %v95_v37 = vld.sshfl [vmem:[#allocation1] sm:$0xff pattern:$0x73625140]  ;;  %v98_v38 = vld.sshfl [vmem:[#allocation1 + $0x18] sm:$0xff pattern:$0x73625140]  ;;  %v113_v42 = vpack.c.bf16 %v97_v36, %v97_v36 }
  0x21   :  { %651 = vmatpush.bf16.msra.mxu1 %v1257_v13  ;;  %v96_v39 = vld.sshfl [vmem:[#allocation1 + $0x8] sm:$0xff pattern:$0x73625140]  ;;  %v1300_v40 = vld [vmem:[#allocation5 + $0x1b8] sm:$0xff]  ;;  %v111_v43 = vpack.c.bf16 %v95_v37, %v95_v37  ;;  %v114_v44 = vpack.c.bf16 %v98_v38, %v98_v38  ;;  %v1282_v50 = vld [vmem:[#allocation5 + $0x128] sm:$0xff] }
  0x22   :  { %664 = vmatpush.bf16.msra.mxu2 %v1265_v14  ;;  %v1308_v41 = vld [vmem:[#allocation5 + $0x1f8] sm:$0xff]  ;;  %v112_v45 = vpack.c.bf16 %v96_v39, %v96_v39  ;;  %v1291_v47 = vld [vmem:[#allocation5 + $0x170] sm:$0xff]  ;;  %v1290_v51 = vld [vmem:[#allocation5 + $0x168] sm:$0xff] }
  0x23   :  { %677 = vmatpush.bf16.msra.mxu3 %v1273_v15  ;;  %v1299_v48 = vld [vmem:[#allocation5 + $0x1b0] sm:$0xff]  ;;  %v1298_v52 = vld [vmem:[#allocation5 + $0x1a8] sm:$0xff]  ;;  %v1281_v54 = vld [vmem:[#allocation5 + $0x120] sm:$0xff] }
  0x24   :  { %639 = vmatpush.bf16.msra.mxu0 %v1248_v17  ;;  %v1307_v49 = vld [vmem:[#allocation5 + $0x1f0] sm:$0xff]  ;;  %v1306_v53 = vld [vmem:[#allocation5 + $0x1e8] sm:$0xff]  ;;  %v1289_v55 = vld [vmem:[#allocation5 + $0x160] sm:$0xff] }
  0x25   :  { %652 = vmatpush.bf16.msra.mxu1 %v1256_v18  ;;  %v1297_v56 = vld [vmem:[#allocation5 + $0x1a0] sm:$0xff]  ;;  %v1280_v58 = vld [vmem:[#allocation5 + $0x118] sm:$0xff]  ;;  %v1279_v62 = vld [vmem:[#allocation5 + $0x110] sm:$0xff] }
  0x26   :  { %665 = vmatpush.bf16.msra.mxu2 %v1264_v19  ;;  %v1305_v57 = vld [vmem:[#allocation5 + $0x1e0] sm:$0xff]  ;;  %v1288_v59 = vld [vmem:[#allocation5 + $0x158] sm:$0xff]  ;;  %v1287_v63 = vld [vmem:[#allocation5 + $0x150] sm:$0xff] }
  0x27   :  { %678 = vmatpush.bf16.msra.mxu3 %v1272_v20  ;;  %v1296_v60 = vld [vmem:[#allocation5 + $0x198] sm:$0xff]  ;;  %v1295_v0 = vld [vmem:[#allocation5 + $0x190] sm:$0xff]  ;;  %v1278_v2 = vld [vmem:[#allocation5 + $0x108] sm:$0xff] }
  0x28   :  { %640 = vmatpush.bf16.msra.mxu0 %v1247_v21  ;;  %v1304_v61 = vld [vmem:[#allocation5 + $0x1d8] sm:$0xff]  ;;  %v1303_v1 = vld [vmem:[#allocation5 + $0x1d0] sm:$0xff]  ;;  %v1286_v3 = vld [vmem:[#allocation5 + $0x148] sm:$0xff] }
  0x29   :  { %653 = vmatpush.bf16.msra.mxu1 %v1255_v22  ;;  %v1294_v4 = vld [vmem:[#allocation5 + $0x188] sm:$0xff]  ;;  %v1277_v6 = vld [vmem:[#allocation5 + $0x100] sm:$0xff]  ;;  %v100_v11 = vld.sshfl [vmem:[#allocation1 + $0x28] sm:$0xff pattern:$0x73625140] }
  0x2a   :  { %666 = vmatpush.bf16.msra.mxu2 %v1263_v23  ;;  %v1302_v5 = vld [vmem:[#allocation5 + $0x1c8] sm:$0xff]  ;;  %v1285_v7 = vld [vmem:[#allocation5 + $0x140] sm:$0xff]  ;;  %v101_v12 = vld.sshfl [vmem:[#allocation1 + $0x30] sm:$0xff pattern:$0x73625140]  ;;  %v116_v15 = vpack.c.bf16 %v100_v11, %v100_v11 }
  0x2b   :  { %679 = vmatpush.bf16.msra.mxu3 %v1271_v24  ;;  %v1293_v8 = vld [vmem:[#allocation5 + $0x180] sm:$0xff]  ;;  %v99_v10 = vld.sshfl [vmem:[#allocation1 + $0x20] sm:$0xff pattern:$0x73625140]  ;;  %v117_v16 = vpack.c.bf16 %v101_v12, %v101_v12  ;;  %v1316_v18 = vld [vmem:[#allocation7 + $0x38] sm:$0xff] }
  0x2c   :  { %641 = vmatpush.bf16.msra.mxu0 %v1246_v25  ;;  %v1301_v9 = vld [vmem:[#allocation5 + $0x1c0] sm:$0xff]  ;;  %v115_v14 = vpack.c.bf16 %v99_v10, %v99_v10  ;;  %v1315_v19 = vld [vmem:[#allocation7 + $0x30] sm:$0xff]  ;;  %v1314_v20 = vld [vmem:[#allocation7 + $0x28] sm:$0xff] }
  0x2d   :  { %654 = vmatpush.bf16.msra.mxu1 %v1254_v26  ;;  %v102_v13 = vld.sshfl [vmem:[#allocation1 + $0x38] sm:$0xff pattern:$0x73625140]  ;;  %v1312_v22 = vld [vmem:[#allocation7 + $0x18] sm:$0xff]  ;;  %v1311_v24 = vld [vmem:[#allocation7 + $0x10] sm:$0xff] }
  0x2e   :  { %667 = vmatpush.bf16.msra.mxu2 %v1262_v27  ;;  %v118_v17 = vpack.c.bf16 %v102_v13, %v102_v13  ;;  %v1313_v21 = vld [vmem:[#allocation7 + $0x20] sm:$0xff]  ;;  %v1310_v26 = vld [vmem:[#allocation7 + $0x8] sm:$0xff]  ;;  %v1323_v36 = vld [vmem:[#allocation8 + $0x30] sm:$0xff] }
  0x2f   :  { %680 = vmatpush.bf16.msra.mxu3 %v1270_v28  ;;  %v1322_v38 = vld [vmem:[#allocation8 + $0x28] sm:$0xff] }
  0x30   :  { %642 = vmatpush.bf16.msra.mxu0 %v1245_v30  ;;  %v1309_v30 = vld [vmem:[#allocation7] sm:$0xff] }
  0x31   :  { %655 = vmatpush.bf16.msra.mxu1 %v1253_v31 }
  0x32   :  { %668 = vmatpush.bf16.msra.mxu2 %v1261_v32  ;;  %v1332_v32 = vld [vmem:[%s1536_s2] ss:$0 sm:$0xff] }
  0x33   :  { %681 = vmatpush.bf16.msra.mxu3 %v1269_v33  ;;  %643 = vmatmul.bf16.vlgmr.msra.gmra.mxu0 %v111_v43  ;;  %v1324_v33 = vld [vmem:[#allocation8 + $0x38] sm:$0xff] }
  0x34   :  { %687 = vmatpush.bf16.msrb.mxu0 %v1284_v34  ;;  %656 = vmatmul.bf16.vlgmr.msra.gmra.mxu1 %v112_v45 }
  0x35   :  { %700 = vmatpush.bf16.msrb.mxu1 %v1292_v35  ;;  %669 = vmatmul.bf16.vlgmr.msra.gmra.mxu2 %v113_v42  ;;  %v1320_v42 = vld [vmem:[#allocation8 + $0x18] sm:$0xff] }
  0x36   :  { %713 = vmatpush.bf16.msrb.mxu2 %v1300_v40  ;;  %682 = vmatmul.bf16.vlgmr.msra.gmra.mxu3 %v114_v44  ;;  %v1321_v40 = vld [vmem:[#allocation8 + $0x20] sm:$0xff] }
  0x37   :  { %726 = vmatpush.bf16.msrb.mxu3 %v1308_v41 }
  0x38   :  { %688 = vmatpush.bf16.msrb.mxu0 %v1283_v46 }
  0x39   :  { %701 = vmatpush.bf16.msrb.mxu1 %v1291_v47  ;;  %v1319_v47 = vld [vmem:[#allocation8 + $0x10] sm:$0xff] }
  0x3a   :  { %714 = vmatpush.bf16.msrb.mxu2 %v1299_v48 }
  0x3b   :  { %727 = vmatpush.bf16.msrb.mxu3 %v1307_v49 }
  0x3c   :  { %689 = vmatpush.bf16.msrb.mxu0 %v1282_v50 }
  0x3d   :  { %702 = vmatpush.bf16.msrb.mxu1 %v1290_v51 }
  0x3e   :  { %715 = vmatpush.bf16.msrb.mxu2 %v1298_v52 }
  0x3f   :  { %728 = vmatpush.bf16.msrb.mxu3 %v1306_v53 }
  0x40   :  { %690 = vmatpush.bf16.msrb.mxu0 %v1281_v54 }
  0x41   :  { %703 = vmatpush.bf16.msrb.mxu1 %v1289_v55 }
  0x42   :  { %716 = vmatpush.bf16.msrb.mxu2 %v1297_v56 }
  0x43   :  { %729 = vmatpush.bf16.msrb.mxu3 %v1305_v57 }
  0x44   :  { %691 = vmatpush.bf16.msrb.mxu0 %v1280_v58 }
  0x45   :  { %704 = vmatpush.bf16.msrb.mxu1 %v1288_v59  ;;  %v1318_v59 = vld [vmem:[#allocation8 + $0x8] sm:$0xff] }
  0x46   :  { %717 = vmatpush.bf16.msrb.mxu2 %v1296_v60  ;;  %v1317_v60 = vld [vmem:[#allocation8] sm:$0xff] }
  0x47   :  { %730 = vmatpush.bf16.msrb.mxu3 %v1304_v61  ;;  %v1333_v61 = vld [vmem:[%s1538_s4] ss:$0 sm:$0xff] }
  0x48   :  { %692 = vmatpush.bf16.msrb.mxu0 %v1279_v62 }
  0x49   :  { %705 = vmatpush.bf16.msrb.mxu1 %v1287_v63 }
  0x4a   :  { %718 = vmatpush.bf16.msrb.mxu2 %v1295_v0 }
  0x4b   :  { %731 = vmatpush.bf16.msrb.mxu3 %v1303_v1 }
  0x4c   :  { %693 = vmatpush.bf16.msrb.mxu0 %v1278_v2 }
  0x4d   :  { %706 = vmatpush.bf16.msrb.mxu1 %v1286_v3  ;;  %v1334_v3 = vld [vmem:[%s1540_s6] ss:$0 sm:$0xff] }
  0x4e   :  { %719 = vmatpush.bf16.msrb.mxu2 %v1294_v4 }
  0x4f   :  { %732 = vmatpush.bf16.msrb.mxu3 %v1302_v5 }
  0x50   :  { %694 = vmatpush.bf16.msrb.mxu0 %v1277_v6 }
  0x51   :  { %707 = vmatpush.bf16.msrb.mxu1 %v1285_v7 }
  0x52   :  { %720 = vmatpush.bf16.msrb.mxu2 %v1293_v8 }
  0x53   :  { %733 = vmatpush.bf16.msrb.mxu3 %v1301_v9  ;;  %695 = vmatmul.bf16.vlgmr.msrb.gmra.mxu0 %v115_v14 }
  0x54   :  { %708 = vmatmul.bf16.vlgmr.msrb.gmra.mxu1 %v116_v15  ;;  %809 = vmatpush.bf16.msra.mxu0 %v1316_v18 }
  0x55   :  { %721 = vmatmul.bf16.vlgmr.msrb.gmra.mxu2 %v117_v16  ;;  %892 = vmatpush.bf16.msra.mxu1 %v1324_v33 }
  0x56   :  { %734 = vmatmul.bf16.vlgmr.msrb.gmra.mxu3 %v118_v17 }
  0x58   :  { %810 = vmatpush.bf16.msra.mxu0 %v1315_v19 }
  0x59   :  { %893 = vmatpush.bf16.msra.mxu1 %v1323_v36 }
  0x5c   :  { %811 = vmatpush.bf16.msra.mxu0 %v1314_v20 }
  0x5d   :  { %894 = vmatpush.bf16.msra.mxu1 %v1322_v38 }
  0x60   :  { %812 = vmatpush.bf16.msra.mxu0 %v1313_v21 }
  0x61   :  { %895 = vmatpush.bf16.msra.mxu1 %v1321_v40 }
  0x64   :  { %813 = vmatpush.bf16.msra.mxu0 %v1312_v22 }
  0x65   :  { %896 = vmatpush.bf16.msra.mxu1 %v1320_v42 }
  0x68   :  { %814 = vmatpush.bf16.msra.mxu0 %v1311_v24 }
  0x69   :  { %897 = vmatpush.bf16.msra.mxu1 %v1319_v47 }
  0x6c   :  { %815 = vmatpush.bf16.msra.mxu0 %v1310_v26 }
  0x6d   :  { %898 = vmatpush.bf16.msra.mxu1 %v1318_v59 }
  0x70   :  { %816 = vmatpush.bf16.msra.mxu0 %v1309_v30 }
  0x71   :  { %899 = vmatpush.bf16.msra.mxu1 %v1317_v60 }
  0xb0   :  { %v644_v23 = vpop.f32.mrf.mxu0 }
  0xb1   :  { %v657_v25 = vpop.f32.mrf.mxu1  ;;  %v645_v37 = vadd.f32 %v1332_v32, %v644_v23 }
  0xb3   :  { %v658_v39 = vadd.f32 %v657_v25, %v645_v37 }
  0xb8   :  { %v670_v27 = vpop.f32.mrf.mxu2  ;;  %v646_v29 = vpop.f32.mrf.mxu0 }
  0xb9   :  { %v683_v28 = vpop.f32.mrf.mxu3  ;;  %v659_v31 = vpop.f32.mrf.mxu1  ;;  %v671_v41 = vadd.f32 %v670_v27, %v658_v39 }
  0xbb   :  { %v684_v43 = vadd.f32 %v683_v28, %v671_v41 }
  0xc0   :  { %v672_v34 = vpop.f32.mrf.mxu2 }
  0xc1   :  { %v685_v35 = vpop.f32.mrf.mxu3 }
  0xd0   :  { %v696_v44 = vpop.f32.mrf.mxu0 }
  0xd1   :  { %v709_v45 = vpop.f32.mrf.mxu1  ;;  %v697_v46 = vadd.f32 %v696_v44, %v684_v43 }
  0xd3   :  { %v710_v48 = vadd.f32 %v709_v45, %v697_v46 }
  0xd8   :  { %v722_v49 = vpop.f32.mrf.mxu2  ;;  %v698_v52 = vpop.f32.mrf.mxu0 }
  0xd9   :  { %v735_v50 = vpop.f32.mrf.mxu3  ;;  %v723_v51 = vadd.f32 %v722_v49, %v710_v48  ;;  %v711_v53 = vpop.f32.mrf.mxu1 }
  0xdb   :  { %v736_v54 = vadd.f32 %v735_v50, %v723_v51 }
  0xdd   :  { %v739_v55 = vmax.f32 %v736_v54, 0.0 }
  0xdf   :  { %v740_v56 = vpack.c.bf16 %v739_v55, %v739_v55 }
  0xe0   :  { %v724_v57 = vpop.f32.mrf.mxu2 }
  0xe1   :  { %v737_v58 = vpop.f32.mrf.mxu3  ;;  %817 = vmatmul.bf16.vlgmr.msra.gmra.mxu0 %v740_v56 }
 0x15e   :  { %v818_v62 = vpop.f32.mrf.mxu0 }
 0x15f   :  { %v819_v63 = vadd.f32 %v1333_v61, %v818_v62 }
 0x161   :  { %v822_v0 = vmax.f32 %v819_v63, 0.0 }
 0x163   :  { %v823_v1 = vpack.c.bf16 %v822_v0, %v822_v0 }
 0x165   :  { %900 = vmatmul.bf16.vlgmr.msra.gmra.mxu1 %v823_v1 }
 0x166   :  { %v820_v2 = vpop.f32.mrf.mxu0 }
 0x1e2   :  { %v901_v4 = vpop.f32.mrf.mxu1 }
 0x1e3   :  { %v902_v5 = vadd.f32 %v1334_v3, %v901_v4 }
 0x1e5   :  { %905 = vst [vmem:[#allocation10] sm:$0x3] %v902_v5 }
 0x1e6   :  { %916 = dma.vmem_to_hbm [thread:$0]  %s912_s25, 32, %s914_s28, [#allocation4]  }
 0x1ea   :  { %v903_v6 = vpop.f32.mrf.mxu1 }
 0x1eb   :  { %1461 = dma.done.wait [#allocation4], 32  }
 0x1ec   :  { %1462 = vsyncadd [#allocation4], 4294967264 }
 0x1ed   :  { %921 = vsyncpa [#allocation3], 1 }
 0x1ee   :  { %922 = vsyncpa [#allocation6], 1 }
 0x1ef   :  { %923 = vsyncpa [#allocation9], 1 }
 0x1f0   :  { %924 = vsyncpa [#allocation4], 1 }

</bundles_post_ra>
